<compile_context>
chip_gen: v6e
topology: v6e:2x2x1
jax: 0.10.0
libtpu: 0.0.40
codegen_flags: <defaults>
</compile_context>

<pallas_src>
import functools

import jax
import jax.numpy as jnp
from jax.experimental import pallas as pl
from jax.experimental.pallas import tpu as pltpu

_MAX_TILE_B = 8192


def _label_smoothing_kernel(pred_ref, tgt_ref, loss_ref, *,
                            confidence, smooth_off, batch, tile_b,
                            apply_log_softmax):
    """One grid step: (tile_b, C) logits tile -> (tile_b, 1) per-row losses."""
    i = pl.program_id(0)
    tb, c = pred_ref.shape  # static block shape

    # Per-class weights (== true_dist): confidence at the target column,
    # smoothing/(C-1) elsewhere.  One fused weighted reduce replaces the
    # separate sum(pred) and pred[target] reductions.
    col = jax.lax.broadcasted_iota(jnp.int32, (tb, c), 1)
    one_hot = col == tgt_ref[...]                               # (tb, c) bool
    w = jnp.where(one_hot, jnp.float32(confidence), jnp.float32(smooth_off))
    wsum = jnp.sum(w * pred_ref[...].astype(jnp.float32),
                   axis=-1, keepdims=True)                      # (tb, 1)

    if apply_log_softmax:
        # log_softmax normalizer; since sum(true_dist) == 1 it contributes
        # exactly (row_max + lse) per row.
        p = pred_ref[...].astype(jnp.float32)
        row_max = jnp.max(p, axis=-1, keepdims=True)            # (tb, 1)
        lse = jnp.log(jnp.sum(jnp.exp(p - row_max),
                              axis=-1, keepdims=True))          # (tb, 1)
        base = row_max + lse
    else:
        # logits=False: pred is already log-probabilities.
        base = jnp.zeros((tb, 1), dtype=jnp.float32)

    row_loss = base - wsum                                      # (tb, 1)

    # Zero contributions of rows past the true batch.  The last grid block is
    # ragged (no wrapper padding), so its trailing rows hold garbage VMEM
    # data; per-row reduces keep valid rows uncontaminated and this mask
    # (applied AFTER the reduces) zeroes the garbage rows' outputs.
    row_idx = i * tile_b + jax.lax.broadcasted_iota(jnp.int32, (tb, 1), 0)
    loss_ref[...] = jnp.where(row_idx < batch, row_loss, 0.0)


def _vmem_budgets():
    """(working-set budget, scoped vmem limit) in bytes, per TPU generation."""
    try:
        cap = pltpu.get_tpu_info().vmem_capacity_bytes
    except Exception:  # unknown backend / interpret mode
        cap = None
    if cap is not None and cap >= 100 * 1024 * 1024:
        # v5e / v6e: 128 MiB physical VMEM -> big double-buffered tiles.
        return 48 * 1024 * 1024, 96 * 1024 * 1024
    # v7x (64 MiB per TensorCore) or unknown: stay conservative so the
    # double-buffered logits blocks + f32 intermediates never spill.
    return 28 * 1024 * 1024, 48 * 1024 * 1024


def _pick_tile_b(batch, num_classes, itemsize, budget_bytes):
    """Largest VMEM-budgeted batch tile, sublane-aligned, >= 2 grid steps."""
    sublane = {1: 32, 2: 16}.get(itemsize, 8)
    # Per-row VMEM footprint of one grid step:
    #   2 x double-buffered logits block rows
    #   + ~3 f32 tile-sized intermediates (weighted product, exp, upcast)
    #   + lane-padded (tile_b, 1) target and output blocks (-> 128 lanes, x2 bufs)
    bytes_per_row = (2 * num_classes * itemsize
                     + 3 * num_classes * 4
                     + 2 * 512 + 2 * 512)
    tile_b = max(1, budget_bytes // bytes_per_row)
    tile_b = min(tile_b, _MAX_TILE_B)

    # Guarantee >= 2 grid steps so the "parallel" batch axis can be sharded
    # across both TensorCores on v7x (harmless single-TC elsewhere).
    if batch > sublane:
        half = pl.cdiv(batch, 2)
        half = pl.cdiv(half, sublane) * sublane
        tile_b = min(tile_b, half)

    tile_b = max(sublane, (tile_b // sublane) * sublane)
    if batch < sublane:
        # Block equal to the full (small) batch dim is always legal.
        tile_b = batch
    else:
        tile_b = min(tile_b, pl.cdiv(batch, sublane) * sublane)
    return tile_b


def label_smoothing_loss(pred, target, *, num_classes, smoothing=0.1,
                         logits=True, tile_b=None):
    """Pallas implementation of LabelSmoothingLoss.forward.

    pred:   (B, num_classes) float array (logits if `logits=True`,
            log-probabilities otherwise); f32 or bf16.
    target: (B,) int array of class indices
    returns scalar float32 loss
    """
    assert 0.0 <= smoothing < 1.0
    assert num_classes >= 2
    B, C = pred.shape
    assert C == num_classes

    itemsize = jnp.dtype(pred.dtype).itemsize
    budget_bytes, vmem_limit = _vmem_budgets()
    if tile_b is None:
        tile_b = _pick_tile_b(B, C, itemsize, budget_bytes)

    num_tiles = pl.cdiv(B, tile_b)          # ragged last block; no pred padding
    tgt2d = target.astype(jnp.int32).reshape(B, 1)

    confidence = 1.0 - smoothing
    smooth_off = smoothing / (num_classes - 1)

    kernel = functools.partial(
        _label_smoothing_kernel,
        confidence=confidence,
        smooth_off=smooth_off,
        batch=B,
        tile_b=tile_b,
        apply_log_softmax=bool(logits),
    )

    cost = pl.CostEstimate(
        flops=int((7 if logits else 4) * B * C),
        transcendentals=int(B * C) if logits else 0,
        bytes_accessed=int(B * C * itemsize + 2 * B * 4),
    )

    # TODO(synk): for C < 128, pack 128//C logical rows per physical row
    # (wrapper reshape + `col % C` compare) to restore lane density; and for
    # vocab-scale C add a class-axis grid with online max/logsumexp.
    # TODO(synk): lane-dense (1, tile_b) target blocks would shave the
    # (tile_b, 128)-padded target buffers, at the cost of an in-kernel
    # lane->sublane relayout; kept (tile_b, 1) for guaranteed lowering.
    row_losses = pl.pallas_call(
        kernel,
        out_shape=jax.ShapeDtypeStruct((B, 1), jnp.float32),
        grid_spec=pltpu.PrefetchScalarGridSpec(
            num_scalar_prefetch=0,
            grid=(num_tiles,),
            in_specs=[
                pl.BlockSpec((tile_b, C), lambda i: (i, 0)),   # logits tile
                pl.BlockSpec((tile_b, 1), lambda i: (i, 0)),   # targets tile
            ],
            out_specs=pl.BlockSpec((tile_b, 1), lambda i: (i, 0)),
        ),
        compiler_params=pltpu.CompilerParams(
            dimension_semantics=("parallel",),
            vmem_limit_bytes=vmem_limit,
        ),
        cost_estimate=cost,
    )(pred, tgt2d)

    # Unscaled f32 accumulation of per-row losses, single divide at the end.
    return jnp.sum(row_losses) / jnp.float32(B)


def _reference(pred, target, num_classes, smoothing, logits=True):
    p = pred.astype(jnp.float32)
    if logits:
        p = jax.nn.log_softmax(p, axis=-1)
    confidence = 1.0 - smoothing
    off = smoothing / (num_classes - 1)
    true_dist = jnp.full_like(p, off)
    true_dist = true_dist.at[jnp.arange(pred.shape[0]), target].set(confidence)
    return jnp.mean(jnp.sum(-true_dist * p, axis=-1))


if __name__ == "__main__":
    smoothing = 0.1
    key = jax.random.PRNGKey(0)

    # 1) logits=True, batch divisible by the tile.
    B, C = 16, 32
    kp, kt = jax.random.split(key)
    pred = jax.random.normal(kp, (B, C), dtype=jnp.float32)
    target = jax.random.randint(kt, (B,), 0, C, dtype=jnp.int32)
    loss = jax.block_until_ready(
        label_smoothing_loss(pred, target, num_classes=C,
                             smoothing=smoothing, logits=True))
    ref = _reference(pred, target, C, smoothing, logits=True)
    assert jnp.allclose(loss, ref, rtol=1e-4, atol=1e-5), (loss, ref)

    # 2) logits=False path (pred already log-probabilities).
    logp_in = jax.nn.log_softmax(pred, axis=-1)
    loss2 = jax.block_until_ready(
        label_smoothing_loss(logp_in, target, num_classes=C,
                             smoothing=smoothing, logits=False))
    ref2 = _reference(logp_in, target, C, smoothing, logits=False)
    assert jnp.allclose(loss2, ref2, rtol=1e-4, atol=1e-5), (loss2, ref2)

    # 3) Ragged batch (exercises the un-padded last block + row mask).
    Br = 13
    kp2, kt2 = jax.random.split(kp)
    pred_r = jax.random.normal(kp2, (Br, C), dtype=jnp.float32)
    target_r = jax.random.randint(kt2, (Br,), 0, C, dtype=jnp.int32)
    loss3 = jax.block_until_ready(
        label_smoothing_loss(pred_r, target_r, num_classes=C,
                             smoothing=smoothing, logits=True))
    ref3 = _reference(pred_r, target_r, C, smoothing, logits=True)
    assert jnp.allclose(loss3, ref3, rtol=1e-4, atol=1e-5), (loss3, ref3)

    # 4) bf16 logits.
    pred_bf = pred.astype(jnp.bfloat16)
    loss4 = jax.block_until_ready(
        label_smoothing_loss(pred_bf, target, num_classes=C,
                             smoothing=smoothing, logits=True))
    ref4 = _reference(pred_bf, target, C, smoothing, logits=True)
    assert jnp.allclose(loss4, ref4, rtol=2e-2, atol=2e-2), (loss4, ref4)

    print("KERNEL_OK")
</pallas_src>

<mosaic_0001>
module attributes {stable_mosaic.version = 11 : i64} {
  func.func @_label_smoothing_kernel(%arg0: i32, %arg1: memref<8x32xf32, #tpu.memory_space<vmem>>, %arg2: memref<8x1xi32, #tpu.memory_space<vmem>>, %arg3: memref<8x1xf32, #tpu.memory_space<vmem>>) attributes {dimension_semantics = [#tpu.dimension_semantics<parallel>], iteration_bounds = array<i64: 2>, scalar_prefetch = 0 : i64, scratch_operands = 0 : i64, tpu.core_type = #tpu.core_type<tc>, window_params = [{transform_indices = @transform_0, window_bounds = array<i64: 8, 32>}, {transform_indices = @transform_1, window_bounds = array<i64: 8, 1>}, {transform_indices = @transform_2, window_bounds = array<i64: 8, 1>}]} {
    %0 = tpu.iota {dimensions = array<i32: 1>} : vector<8x32xi32>
    %c0 = arith.constant 0 : index
    %c0_0 = arith.constant 0 : index
    %1 = vector.load %arg2[%c0, %c0_0] : memref<8x1xi32, #tpu.memory_space<vmem>>, vector<8x1xi32>
    %2 = vector.broadcast %1 : vector<8x1xi32> to vector<8x32xi32>
    %3 = arith.cmpi eq, %0, %2 : vector<8x32xi32>
    %cst = arith.constant 0.899999976 : f32
    %cst_1 = arith.constant 0.0032258064 : f32
    %4 = vector.broadcast %cst : f32 to vector<8x32xf32>
    %5 = vector.broadcast %cst_1 : f32 to vector<8x32xf32>
    %6 = arith.select %3, %4, %5 : vector<8x32xi1>, vector<8x32xf32>
    %c0_2 = arith.constant 0 : index
    %c0_3 = arith.constant 0 : index
    %7 = vector.load %arg1[%c0_2, %c0_3] : memref<8x32xf32, #tpu.memory_space<vmem>>, vector<8x32xf32>
    %8 = arith.mulf %6, %7 : vector<8x32xf32>
    %cst_4 = arith.constant dense<0.000000e+00> : vector<8xf32>
    %9 = vector.multi_reduction <add>, %8, %cst_4 [1] : vector<8x32xf32> to vector<8xf32>
    %10 = vector.shape_cast %9 : vector<8xf32> to vector<8x1xf32>
    %c0_5 = arith.constant 0 : index
    %c0_6 = arith.constant 0 : index
    %11 = vector.load %arg1[%c0_5, %c0_6] : memref<8x32xf32, #tpu.memory_space<vmem>>, vector<8x32xf32>
    %cst_7 = arith.constant dense<0xFF800000> : vector<8xf32>
    %12 = vector.multi_reduction <maximumf>, %11, %cst_7 [1] : vector<8x32xf32> to vector<8xf32>
    %13 = vector.shape_cast %12 : vector<8xf32> to vector<8x1xf32>
    %14 = vector.broadcast %13 : vector<8x1xf32> to vector<8x32xf32>
    %15 = arith.subf %11, %14 : vector<8x32xf32>
    %16 = math.exp %15 : vector<8x32xf32>
    %cst_8 = arith.constant dense<0.000000e+00> : vector<8xf32>
    %17 = vector.multi_reduction <add>, %16, %cst_8 [1] : vector<8x32xf32> to vector<8xf32>
    %18 = vector.shape_cast %17 : vector<8xf32> to vector<8x1xf32>
    %19 = math.log %18 : vector<8x1xf32>
    %20 = arith.addf %13, %19 : vector<8x1xf32>
    %21 = arith.subf %20, %10 : vector<8x1xf32>
    %c8_i32 = arith.constant 8 : i32
    %22 = arith.muli %arg0, %c8_i32 : i32
    %23 = tpu.iota {dimensions = array<i32: 0>} : vector<8x1xi32>
    %24 = vector.broadcast %22 : i32 to vector<8x1xi32>
    %25 = arith.addi %24, %23 : vector<8x1xi32>
    %c16_i32 = arith.constant 16 : i32
    %26 = vector.broadcast %c16_i32 : i32 to vector<8x1xi32>
    %27 = arith.cmpi slt, %25, %26 : vector<8x1xi32>
    %cst_9 = arith.constant 0.000000e+00 : f32
    %28 = vector.broadcast %cst_9 : f32 to vector<8x1xf32>
    %29 = arith.select %27, %21, %28 : vector<8x1xi1>, vector<8x1xf32>
    %c0_10 = arith.constant 0 : index
    %c0_11 = arith.constant 0 : index
    %30 = vector.load %arg3[%c0_10, %c0_11] : memref<8x1xf32, #tpu.memory_space<vmem>>, vector<8x1xf32>
    tpu.vector_store %arg3[%c0_10, %c0_11], %29 {strides = array<i32>} : memref<8x1xf32, #tpu.memory_space<vmem>>, vector<8x1xf32>,
    return
  }
  func.func @transform_0(%arg0: i32) -> (i32, i32) {
    %c0_i32 = arith.constant 0 : i32
    %c0_i32_0 = arith.constant 0 : i32
    return %arg0, %c0_i32 : i32, i32
  }
  func.func @transform_1(%arg0: i32) -> (i32, i32) {
    %c0_i32 = arith.constant 0 : i32
    %c0_i32_0 = arith.constant 0 : i32
    return %arg0, %c0_i32 : i32, i32
  }
  func.func @transform_2(%arg0: i32) -> (i32, i32) {
    %c0_i32 = arith.constant 0 : i32
    %c0_i32_0 = arith.constant 0 : i32
    return %arg0, %c0_i32 : i32, i32
  }
}

</mosaic_0001>

<bundles_post_ra>
// kernel: tpu_custom_call.1
= control target key start
LH: loop header
LB: loop body
LE: loop exit
PB: predicated region body
PF: predicated region fallthrough
CT: control target
= control target key end

     0   :  { %s308_s9 = smov 0   ;;  %s341_s0 = inlined_call_operand.vmem [shape: f32[16,32], index: 0, kind: input, shape index: {}]   ;;  %s342_s1 = inlined_call_operand.vmem [shape: s32[16,1], index: 1, kind: input, shape index: {}]   ;;  %s343_s2 = inlined_call_operand.vmem [shape: f32[16,1], index: 2, kind: output, shape index: {}]  }
   0x1 LB: > { %s314_s10 = sadd.s32 4294967295, %s289_s9   ;;  %p261_p0 = scmp.ge.s32.totalorder %s289_s9, 1  ;;  %s289_s9 = sphi %s308_s9, %s12_s9  }
   0x2   : > { %p120_p1 = scmp.lt.s32.totalorder %s289_s9, 3 }
   0x4   : > { %p121_p2 = pnand %p261_p0, %p120_p1 }
   0x5   : > { %p144_p3 = scmp.lt.s32.totalorder (!%p121_p2), %s314_s10, 1  ;;  %s265_s19 = sshll.u32 (!%p121_p2), %s314_s10, 3 }
   0x6   : > { %124 = sbr.rel (%p121_p2) target bundleno = 334 (0x14e), region = 28 }
   0xb   : > { %v291_v0 = vmov 0   ;;  %s145_s11 = scalar_select %p144_p3, %s314_s10, 1  ;;  %vm166_vm0 = vcmask 261120   ;;  %v156_v7 = vlaneseq  ;;  %v292_v10 = vmov 0.0032258064  }
   0xc   : > { %278 = vset.pattern.permute.xlu0 %v291_v0  ;;  %v186_v18 = vstv %s265_s19  ;;  %vm190_vm3 = vcmask 7168  }
   0xd   : > { %s320_s12 = sshll.u32 %s145_s11, 3  ;;  %v157_v8 = vand.u32 127, %v156_v7  ;;  %v185_v17 = vshrl.u32 %v156_v7, 7 }
   0xe   : > { %s147_s15 = scalar_lea.vmem %s341_s0, %s320_s12  ;;  %s151_s18 = scalar_lea.vmem %s342_s1, %s320_s12 }
   0xf   : > { %v164_v1 = vld [vmem:[%s147_s15] sm:$0xff]  ;;  %v187_v20 = vadd.s32 %v186_v18, %v185_v17  ;;  %s155_s22 = scalar_lea.vmem %s343_s2, %s320_s12 }
  0x10   : > { %v170_v2 = vsel %vm166_vm0, %v164_v1, -inf  ;;  %v158_v3 = vld [vmem:[%s151_s18] sm:$0xff] }
  0x11   : > { %171 = vmax.xlane.f32.xlu0 %v170_v2  ;;  %vm188_vm2 = vcmp.lt.s32.totalorder %v187_v20, 16 }
  0x27   : > { %160 = vperm.xlu0 %278, %v158_v3  }
  0x9a   : > { %v172_v4 = vpop.xlane.xlu0 %171 }
  0x9b   : > { %v173_v5 = vsub.f32 %v164_v1, %v172_v4 }
  0x9d   : > { %v174_v6 = vmul.f32 1.442695, %v173_v5 }
  0x9f   : > { %279 = vpow2.f32 %v174_v6 }
  0xa2   : > { %v161_v9 = vpop.permute.xlu0 %160 }
  0xa3   : > { %vm162_vm1 = vcmp.eq.s32.totalorder %v157_v8, %v161_v9 }
  0xa4   : > { %v163_v11 = vsel %vm162_vm1, 0.9, %v292_v10 }
  0xa5   : > { %v165_v12 = vmul.f32 %v164_v1, %v163_v11 }
  0xa7   : > { %v167_v15 = vsel %vm166_vm0, %v165_v12, 0.0 }
  0xac   : > { %v280_v13 = vpop.eup %279 }
  0xad   : > { %v176_v14 = vsel %vm166_vm0, %v280_v13, 0.0 }
  0xae   : > { %177 = vadd.xlane.f32.xlu1 %v176_v14 }
  0xb2   : > { %168 = vadd.xlane.f32.xlu1 %v167_v15 }
 0x137   : > { %v178_v16 = vpop.xlane.xlu1 %177 }
 0x138   : > { %281 = vlog2.f32 %v178_v16 }
 0x13b   : > { %v169_v22 = vpop.xlane.xlu1 %168 }
 0x145   : > { %v282_v19 = vpop.eup %281 }
 0x146   : > { %v180_v21 = vmul.f32 0.6931472, %v282_v19 }
 0x148   : > { %v181_v23 = vadd.f32 %v180_v21, %v172_v4 }
 0x14a   : > { %v182_v24 = vsub.f32 %v181_v23, %v169_v22 }
 0x14c   : > { %v189_v25 = vsel %vm188_vm2, %v182_v24, 0.0 }
 0x14d   : > { %191 = vst.msk [vmem:[%s155_s22] sm:$0xff] %vm190_vm3, %v189_v25 }
 0x14e PF: > { %s12_s9 = sadd.s32 1, %s289_s9  }
 0x14f   : > { %p9_p4 = scmp.ge.s32.totalorder %s12_s9, 4  }
 0x151   :  { %11 = sbr.rel (!%p9_p4) target bundleno = 1 (0x1), region = 61 }

</bundles_post_ra>
